<compile_context>
chip_gen: v7x
topology: tpu7x:2x2x1
jax: 0.10.0
libtpu: 0.0.40
codegen_flags: <defaults>
</compile_context>

<pallas_src>
import functools

import jax
import jax.numpy as jnp
from jax.experimental import pallas as pl
from jax.experimental.pallas import tpu as pltpu

LANE = 128          # lane width: pad the internal feature dim to a multiple of this
TB_DEFAULT = 512    # batch tile (rows) for realistic PPO rollout batches


def _round_up(n, m):
    return ((n + m - 1) // m) * m


def _pick_batch_tile(batch, tb):
    """Batch tile: one tile for small batches, else ~tb with an even tile count (v7x)."""
    if batch <= tb:
        return _round_up(batch, 8)
    n_tiles = pl.cdiv(batch, tb)
    if n_tiles > 1 and n_tiles % 2 == 1:
        n_tiles += 1          # best-effort even tile count so v7x's 2 TCs stay balanced
    return _round_up(pl.cdiv(batch, n_tiles), 8)


def actor_ppo_fwd_kernel(x_ref, w1_ref, b1_ref, w2_ref, b2_ref,
                         w3_ref, b3_ref, w4_ref, b4_ref, out_ref):
    # state arrives f32 and is cast to bf16 on-chip (MXU-native); every matmul
    # accumulates in f32, and bias/ReLU/hardswish/tanh run in f32 (valid on v5e,
    # which has no bf16 VPU/EUP, and on v6e/v7x).
    x = x_ref[...].astype(jnp.bfloat16)

    # Linear -> ReLU
    h1 = jnp.dot(x, w1_ref[...], preferred_element_type=jnp.float32) + b1_ref[...]
    h1 = jnp.maximum(h1, 0.0)

    # Linear -> ReLU
    h2 = jnp.dot(h1.astype(jnp.bfloat16), w2_ref[...],
                 preferred_element_type=jnp.float32) + b2_ref[...]
    h2 = jnp.maximum(h2, 0.0)

    # Linear -> Hardswish: z * clamp(z + 3, 0, 6) / 6
    z3 = jnp.dot(h2.astype(jnp.bfloat16), w3_ref[...],
                 preferred_element_type=jnp.float32) + b3_ref[...]
    h3 = z3 * jnp.clip(z3 + 3.0, 0.0, 6.0) * (1.0 / 6.0)

    # Linear -> tanh (N = action_dim, un-padded)
    z4 = jnp.dot(h3.astype(jnp.bfloat16), w4_ref[...],
                 preferred_element_type=jnp.float32) + b4_ref[...]
    out_ref[...] = jnp.tanh(z4)


def prepare_params(params):
    """One-time pad + cast of weights/biases (call once, reuse on every forward).

    W is stored [in, out] so y = x @ W + b.  Only the internal mid_dim is padded to a
    lane multiple; state_dim (K of layer 1) and action_dim (N of layer 4) keep their
    true sizes so state/output arrays never need padding or slicing.
    Padded weight rows/cols and bias lanes are zero, so padded lanes stay exactly 0
    through ReLU and hardswish.
    """
    (w1, b1, w2, b2, w3, b3, w4, b4) = params
    state_dim, mid_dim = w1.shape
    action_dim = w4.shape[1]
    m_pad = _round_up(mid_dim, LANE)

    def pad2(a, rows, cols, dtype):
        return jnp.pad(a, ((0, rows - a.shape[0]), (0, cols - a.shape[1]))).astype(dtype)

    packed = (
        pad2(w1, state_dim, m_pad, jnp.bfloat16), pad2(b1, 1, m_pad, jnp.float32),
        pad2(w2, m_pad, m_pad, jnp.bfloat16),     pad2(b2, 1, m_pad, jnp.float32),
        pad2(w3, m_pad, m_pad, jnp.bfloat16),     pad2(b3, 1, m_pad, jnp.float32),
        pad2(w4, m_pad, action_dim, jnp.bfloat16), pad2(b4, 1, action_dim, jnp.float32),
    )
    dims = (state_dim, mid_dim, action_dim, m_pad)
    return packed, dims


@functools.partial(jax.jit, static_argnames=("dims", "tb"))
def actor_ppo_forward(state, packed_params, *, dims, tb=TB_DEFAULT):
    """Pallas forward. `state` is [batch, state_dim] f32; packed_params from prepare_params."""
    state_dim, mid_dim, action_dim, m_pad = dims
    batch = state.shape[0]
    assert state.shape[1] == state_dim

    tb_eff = _pick_batch_tile(batch, tb)
    grid = (pl.cdiv(batch, tb_eff),)   # ragged last tile: OOB input rows are garbage but
                                       # row-independent, and OOB output rows are dropped.

    const2 = lambda i: (0, 0)   # weights/biases: same block every step -> VMEM resident
    in_specs = [
        pl.BlockSpec((tb_eff, state_dim), lambda i: (i, 0)),      # raw, un-padded state tile
        pl.BlockSpec((state_dim, m_pad), const2), pl.BlockSpec((1, m_pad), const2),
        pl.BlockSpec((m_pad, m_pad), const2),     pl.BlockSpec((1, m_pad), const2),
        pl.BlockSpec((m_pad, m_pad), const2),     pl.BlockSpec((1, m_pad), const2),
        pl.BlockSpec((m_pad, action_dim), const2), pl.BlockSpec((1, action_dim), const2),
    ]
    out_spec = pl.BlockSpec((tb_eff, action_dim), lambda i: (i, 0))

    # Cost on real (not padded) dims so XLA doesn't over-prioritize this tiny call.
    weight_bytes = sum(int(p.size) * p.dtype.itemsize for p in packed_params)
    flops = 2 * batch * (state_dim * mid_dim + 2 * mid_dim * mid_dim + mid_dim * action_dim)
    bytes_accessed = state.size * 4 + batch * action_dim * 4 + weight_bytes
    cost = pl.CostEstimate(flops=flops, transcendentals=batch * action_dim,
                           bytes_accessed=bytes_accessed)

    # VMEM: double-buffered weights/biases + double-buffered I/O tiles + a few f32
    # (tb, m_pad) temporaries.  Clamp under v7x's 64 MiB physical VMEM; the explicit
    # limit also lifts v5e's 16 MiB scoped default when tb / mid_dim grow.
    vmem_need = (2 * weight_bytes
                 + 2 * tb_eff * (state_dim + action_dim) * 4
                 + 4 * tb_eff * m_pad * 4)
    vmem_limit = int(min(max(2 * vmem_need, 32 << 20), 48 << 20))

    return pl.pallas_call(
        actor_ppo_fwd_kernel,
        out_shape=jax.ShapeDtypeStruct((batch, action_dim), jnp.float32),
        grid=grid,
        in_specs=in_specs,
        out_specs=out_spec,
        compiler_params=pltpu.CompilerParams(
            dimension_semantics=("parallel",),   # batch tiles split across TCs on v7x
            vmem_limit_bytes=vmem_limit,
        ),
        cost_estimate=cost,
    )(state, *packed_params)


def init_params(key, state_dim, mid_dim, action_dim):
    """Parameter init mirroring the PyTorch module (W stored as [in, out] so y = x @ W + b).

    Layers 1-3: PyTorch default uniform(-1/sqrt(fan_in), 1/sqrt(fan_in)).
    Layer 4: orthogonal init with gain 0.1, bias = 1e-6 (matches layer_norm(..., std=0.1)).
    """
    k1, k2, k3, k4 = jax.random.split(key, 4)

    def lin_init(k, fan_in, fan_out):
        bound = 1.0 / jnp.sqrt(fan_in)
        kw, kb = jax.random.split(k)
        w = jax.random.uniform(kw, (fan_in, fan_out), jnp.float32, -bound, bound)
        b = jax.random.uniform(kb, (1, fan_out), jnp.float32, -bound, bound)
        return w, b

    w1, b1 = lin_init(k1, state_dim, mid_dim)
    w2, b2 = lin_init(k2, mid_dim, mid_dim)
    w3, b3 = lin_init(k3, mid_dim, mid_dim)

    w4 = jax.nn.initializers.orthogonal(scale=0.1)(k4, (mid_dim, action_dim), jnp.float32)
    b4 = jnp.full((1, action_dim), 1e-6, dtype=jnp.float32)

    return (w1, b1, w2, b2, w3, b3, w4, b4)


def reference_forward(state, params):
    """Pure-JAX f32 reference of ActorPPO.forward."""
    (w1, b1, w2, b2, w3, b3, w4, b4) = params
    h = jnp.maximum(state @ w1 + b1, 0.0)
    h = jnp.maximum(h @ w2 + b2, 0.0)
    z = h @ w3 + b3
    h = z * jnp.clip(z + 3.0, 0.0, 6.0) / 6.0
    return jnp.tanh(h @ w4 + b4)


if __name__ == "__main__":
    batch, state_dim, mid_dim, action_dim = 8, 16, 32, 4

    key = jax.random.PRNGKey(0)
    k_state, k_params = jax.random.split(key)

    state = jax.random.normal(k_state, (batch, state_dim), dtype=jnp.float32)
    params = init_params(k_params, state_dim, mid_dim, action_dim)

    # One-time weight prep (pad/cast); reuse across every forward call.
    packed_params, dims = prepare_params(params)

    out = actor_ppo_forward(state, packed_params, dims=dims)
    out = jax.block_until_ready(out)

    ref = reference_forward(state, params)
    assert out.shape == (batch, action_dim), out.shape
    # bf16 MXU inputs (f32 accumulation) -> relaxed tolerance vs the f32 reference.
    assert jnp.allclose(out, ref, atol=5e-2, rtol=5e-2), "mismatch vs pure-JAX reference"

    print("KERNEL_OK")
</pallas_src>

<mosaic_0001>
module attributes {stable_mosaic.version = 11 : i64} {
  func.func @actor_ppo_fwd_kernel(%arg0: i32, %arg1: memref<8x16xf32, #tpu.memory_space<vmem>>, %arg2: memref<16x128xbf16, #tpu.memory_space<vmem>>, %arg3: memref<1x128xf32, #tpu.memory_space<vmem>>, %arg4: memref<128x128xbf16, #tpu.memory_space<vmem>>, %arg5: memref<1x128xf32, #tpu.memory_space<vmem>>, %arg6: memref<128x128xbf16, #tpu.memory_space<vmem>>, %arg7: memref<1x128xf32, #tpu.memory_space<vmem>>, %arg8: memref<128x4xbf16, #tpu.memory_space<vmem>>, %arg9: memref<1x4xf32, #tpu.memory_space<vmem>>, %arg10: memref<8x4xf32, #tpu.memory_space<vmem>>) attributes {dimension_semantics = [#tpu.dimension_semantics<parallel>], iteration_bounds = array<i64: 1>, scalar_prefetch = 0 : i64, scratch_operands = 0 : i64, tpu.core_type = #tpu.core_type<tc>, window_params = [{transform_indices = @transform_0, window_bounds = array<i64: 8, 16>}, {pipeline_mode = #tpu.pipeline_mode<synchronous>, transform_indices = @transform_1, window_bounds = array<i64: 16, 128>}, {pipeline_mode = #tpu.pipeline_mode<synchronous>, transform_indices = @transform_2, window_bounds = array<i64: 1, 128>}, {pipeline_mode = #tpu.pipeline_mode<synchronous>, transform_indices = @transform_3, window_bounds = array<i64: 128, 128>}, {pipeline_mode = #tpu.pipeline_mode<synchronous>, transform_indices = @transform_4, window_bounds = array<i64: 1, 128>}, {pipeline_mode = #tpu.pipeline_mode<synchronous>, transform_indices = @transform_5, window_bounds = array<i64: 128, 128>}, {pipeline_mode = #tpu.pipeline_mode<synchronous>, transform_indices = @transform_6, window_bounds = array<i64: 1, 128>}, {pipeline_mode = #tpu.pipeline_mode<synchronous>, transform_indices = @transform_7, window_bounds = array<i64: 128, 4>}, {pipeline_mode = #tpu.pipeline_mode<synchronous>, transform_indices = @transform_8, window_bounds = array<i64: 1, 4>}, {transform_indices = @transform_9, window_bounds = array<i64: 8, 4>}]} {
    %c0 = arith.constant 0 : index
    %c0_0 = arith.constant 0 : index
    %0 = vector.load %arg1[%c0, %c0_0] : memref<8x16xf32, #tpu.memory_space<vmem>>, vector<8x16xf32>
    %1 = arith.truncf %0 : vector<8x16xf32> to vector<8x16xbf16>
    %c0_1 = arith.constant 0 : index
    %c0_2 = arith.constant 0 : index
    %2 = vector.load %arg2[%c0_1, %c0_2] : memref<16x128xbf16, #tpu.memory_space<vmem>>, vector<16x128xbf16>
    %cst = arith.constant dense<0.000000e+00> : vector<8x128xf32>
    %3 = tpu.matmul %1, %2, %cst {dimension_numbers = #tpu.dot_dimension_numbers<[1], [0], [0], [1], [0, 0, 1, 1], [], []>} : vector<8x16xbf16>, vector<16x128xbf16>, vector<8x128xf32> -> vector<8x128xf32>
    %c0_3 = arith.constant 0 : index
    %c0_4 = arith.constant 0 : index
    %4 = vector.load %arg3[%c0_3, %c0_4] : memref<1x128xf32, #tpu.memory_space<vmem>>, vector<1x128xf32>
    %5 = vector.broadcast %4 : vector<1x128xf32> to vector<8x128xf32>
    %6 = arith.addf %3, %5 : vector<8x128xf32>
    %cst_5 = arith.constant 0.000000e+00 : f32
    %7 = vector.broadcast %cst_5 : f32 to vector<8x128xf32>
    %8 = arith.maximumf %6, %7 : vector<8x128xf32>
    %9 = arith.truncf %8 : vector<8x128xf32> to vector<8x128xbf16>
    %c0_6 = arith.constant 0 : index
    %c0_7 = arith.constant 0 : index
    %10 = vector.load %arg4[%c0_6, %c0_7] : memref<128x128xbf16, #tpu.memory_space<vmem>>, vector<128x128xbf16>
    %cst_8 = arith.constant dense<0.000000e+00> : vector<8x128xf32>
    %11 = tpu.matmul %9, %10, %cst_8 {dimension_numbers = #tpu.dot_dimension_numbers<[1], [0], [0], [1], [0, 0, 1, 1], [], []>} : vector<8x128xbf16>, vector<128x128xbf16>, vector<8x128xf32> -> vector<8x128xf32>
    %c0_9 = arith.constant 0 : index
    %c0_10 = arith.constant 0 : index
    %12 = vector.load %arg5[%c0_9, %c0_10] : memref<1x128xf32, #tpu.memory_space<vmem>>, vector<1x128xf32>
    %13 = vector.broadcast %12 : vector<1x128xf32> to vector<8x128xf32>
    %14 = arith.addf %11, %13 : vector<8x128xf32>
    %cst_11 = arith.constant 0.000000e+00 : f32
    %15 = vector.broadcast %cst_11 : f32 to vector<8x128xf32>
    %16 = arith.maximumf %14, %15 : vector<8x128xf32>
    %17 = arith.truncf %16 : vector<8x128xf32> to vector<8x128xbf16>
    %c0_12 = arith.constant 0 : index
    %c0_13 = arith.constant 0 : index
    %18 = vector.load %arg6[%c0_12, %c0_13] : memref<128x128xbf16, #tpu.memory_space<vmem>>, vector<128x128xbf16>
    %cst_14 = arith.constant dense<0.000000e+00> : vector<8x128xf32>
    %19 = tpu.matmul %17, %18, %cst_14 {dimension_numbers = #tpu.dot_dimension_numbers<[1], [0], [0], [1], [0, 0, 1, 1], [], []>} : vector<8x128xbf16>, vector<128x128xbf16>, vector<8x128xf32> -> vector<8x128xf32>
    %c0_15 = arith.constant 0 : index
    %c0_16 = arith.constant 0 : index
    %20 = vector.load %arg7[%c0_15, %c0_16] : memref<1x128xf32, #tpu.memory_space<vmem>>, vector<1x128xf32>
    %21 = vector.broadcast %20 : vector<1x128xf32> to vector<8x128xf32>
    %22 = arith.addf %19, %21 : vector<8x128xf32>
    %cst_17 = arith.constant 3.000000e+00 : f32
    %23 = vector.broadcast %cst_17 : f32 to vector<8x128xf32>
    %24 = arith.addf %22, %23 : vector<8x128xf32>
    %cst_18 = arith.constant 0.000000e+00 : f32
    %cst_19 = arith.constant 6.000000e+00 : f32
    %25 = vector.broadcast %cst_18 : f32 to vector<8x128xf32>
    %26 = arith.maximumf %25, %24 : vector<8x128xf32>
    %27 = vector.broadcast %cst_19 : f32 to vector<8x128xf32>
    %28 = arith.minimumf %27, %26 : vector<8x128xf32>
    %29 = arith.mulf %22, %28 : vector<8x128xf32>
    %cst_20 = arith.constant 0.166666672 : f32
    %30 = vector.broadcast %cst_20 : f32 to vector<8x128xf32>
    %31 = arith.mulf %29, %30 : vector<8x128xf32>
    %32 = arith.truncf %31 : vector<8x128xf32> to vector<8x128xbf16>
    %c0_21 = arith.constant 0 : index
    %c0_22 = arith.constant 0 : index
    %33 = vector.load %arg8[%c0_21, %c0_22] : memref<128x4xbf16, #tpu.memory_space<vmem>>, vector<128x4xbf16>
    %cst_23 = arith.constant dense<0.000000e+00> : vector<8x4xf32>
    %34 = tpu.matmul %32, %33, %cst_23 {dimension_numbers = #tpu.dot_dimension_numbers<[1], [0], [0], [1], [0, 0, 1, 1], [], []>} : vector<8x128xbf16>, vector<128x4xbf16>, vector<8x4xf32> -> vector<8x4xf32>
    %c0_24 = arith.constant 0 : index
    %c0_25 = arith.constant 0 : index
    %35 = vector.load %arg9[%c0_24, %c0_25] : memref<1x4xf32, #tpu.memory_space<vmem>>, vector<1x4xf32>
    %36 = vector.broadcast %35 : vector<1x4xf32> to vector<8x4xf32>
    %37 = arith.addf %34, %36 : vector<8x4xf32>
    %38 = math.tanh %37 : vector<8x4xf32>
    %c0_26 = arith.constant 0 : index
    %c0_27 = arith.constant 0 : index
    %39 = vector.load %arg10[%c0_26, %c0_27] : memref<8x4xf32, #tpu.memory_space<vmem>>, vector<8x4xf32>
    tpu.vector_store %arg10[%c0_26, %c0_27], %38 {strides = array<i32>} : memref<8x4xf32, #tpu.memory_space<vmem>>, vector<8x4xf32>,
    return
  }
  func.func @transform_0(%arg0: i32) -> (i32, i32) {
    %c0_i32 = arith.constant 0 : i32
    %c0_i32_0 = arith.constant 0 : i32
    return %arg0, %c0_i32 : i32, i32
  }
  func.func @transform_1(%arg0: i32) -> (i32, i32) {
    %c0_i32 = arith.constant 0 : i32
    %c0_i32_0 = arith.constant 0 : i32
    %c0_i32_1 = arith.constant 0 : i32
    return %c0_i32, %c0_i32_0 : i32, i32
  }
  func.func @transform_2(%arg0: i32) -> (i32, i32) {
    %c0_i32 = arith.constant 0 : i32
    %c0_i32_0 = arith.constant 0 : i32
    %c0_i32_1 = arith.constant 0 : i32
    return %c0_i32, %c0_i32_0 : i32, i32
  }
  func.func @transform_3(%arg0: i32) -> (i32, i32) {
    %c0_i32 = arith.constant 0 : i32
    %c0_i32_0 = arith.constant 0 : i32
    %c0_i32_1 = arith.constant 0 : i32
    return %c0_i32, %c0_i32_0 : i32, i32
  }
  func.func @transform_4(%arg0: i32) -> (i32, i32) {
    %c0_i32 = arith.constant 0 : i32
    %c0_i32_0 = arith.constant 0 : i32
    %c0_i32_1 = arith.constant 0 : i32
    return %c0_i32, %c0_i32_0 : i32, i32
  }
  func.func @transform_5(%arg0: i32) -> (i32, i32) {
    %c0_i32 = arith.constant 0 : i32
    %c0_i32_0 = arith.constant 0 : i32
    %c0_i32_1 = arith.constant 0 : i32
    return %c0_i32, %c0_i32_0 : i32, i32
  }
  func.func @transform_6(%arg0: i32) -> (i32, i32) {
    %c0_i32 = arith.constant 0 : i32
    %c0_i32_0 = arith.constant 0 : i32
    %c0_i32_1 = arith.constant 0 : i32
    return %c0_i32, %c0_i32_0 : i32, i32
  }
  func.func @transform_7(%arg0: i32) -> (i32, i32) {
    %c0_i32 = arith.constant 0 : i32
    %c0_i32_0 = arith.constant 0 : i32
    %c0_i32_1 = arith.constant 0 : i32
    return %c0_i32, %c0_i32_0 : i32, i32
  }
  func.func @transform_8(%arg0: i32) -> (i32, i32) {
    %c0_i32 = arith.constant 0 : i32
    %c0_i32_0 = arith.constant 0 : i32
    %c0_i32_1 = arith.constant 0 : i32
    return %c0_i32, %c0_i32_0 : i32, i32
  }
  func.func @transform_9(%arg0: i32) -> (i32, i32) {
    %c0_i32 = arith.constant 0 : i32
    %c0_i32_0 = arith.constant 0 : i32
    return %arg0, %c0_i32 : i32, i32
  }
}

</mosaic_0001>

<bundles_post_ra>
// kernel: actor_ppo_forward.1
= control target key start
LH: loop header
LB: loop body
LE: loop exit
PB: predicated region body
PF: predicated region fallthrough
CT: control target
= control target key end

     0   :  { %14 = vsyncpa [#allocation3], 0  ;;  %s859_s0 = inlined_call_operand.vmem [shape: f32[8,16], index: 0, kind: input, shape index: {}]   ;;  %s860_s1 = inlined_call_operand.hbm [shape: bf16[16,128], index: 1, kind: input, shape index: {}]   ;;  %s861_s2 = inlined_call_operand.vmem [shape: f32[1,128], index: 2, kind: input, shape index: {}]   ;;  %s862_s3 = inlined_call_operand.vmem [shape: bf16[128,128], index: 3, kind: input, shape index: {}]   ;;  %s863_s4 = inlined_call_operand.vmem [shape: f32[1,128], index: 4, kind: input, shape index: {}]   ;;  %s864_s5 = inlined_call_operand.hbm [shape: bf16[128,128], index: 5, kind: input, shape index: {}]   ;;  %s865_s6 = inlined_call_operand.vmem [shape: f32[1,128], index: 6, kind: input, shape index: {}]   ;;  %s866_s7 = inlined_call_operand.vmem [shape: bf16[128,4], index: 7, kind: input, shape index: {}]   ;;  %s867_s8 = inlined_call_operand.vmem [shape: f32[1,4], index: 8, kind: input, shape index: {}]   ;;  %s868_s9 = inlined_call_operand.vmem [shape: f32[8,4], index: 9, kind: output, shape index: {}]  }
   0x1   :  { %15 = vsyncpa [#allocation5], 0  ;;  %s680_s30 = smov [#allocation2]   ;;  %s632_s13 = scalar_lea.hbm %s860_s1, 128 }
   0x2   :  { %s23_s10 = sshll.u32 %s680_s30, 4  ;;  %p633_p0 = scmp.ne.s32.totalorder %s860_s1, %s632_s13  ;;  %s24_s10 = int_to_ptr.vmem [resolvable:$true] %s23_s10 }
   0x3   :  { %p636_p1 = scmp.lt.u32.totalorder %s632_s13, %s860_s1 }
   0x5   :  { %p638_p2 = pnand %p636_p1, %p633_p0 }
   0x7   :  { %641 = shalt.err (!%p638_p2)
}
   0x8   :  { %s642_s18 = scalar_lea.vmem %s24_s10, 128  ;;  %p647_p4 = scmp.lt.s32.totalorder %s24_s10, %s24_s10 }
   0x9   :  { %p643_p3 = scmp.ne.s32.totalorder %s24_s10, %s642_s18  ;;  %p648_p5 = scmp.lt.s32.totalorder %s642_s18, %s642_s18 }
   0xb   :  { %p649_p6 = por %p648_p5, %p647_p4 }
   0xd   :  { %p650_p7 = pnand %p649_p6, %p643_p3 }
   0xf   :  { %653 = shalt.err (!%p650_p7)
}
  0x10   :  { %s681_s19 = smov 64   ;;  %s682_s20 = smov 4  }
  0x11   :  { %29 = dma.hbm_to_vmem [thread:$0]  %s860_s1, 128, %s24_s10, [#allocation3], %s681_s19, %s681_s19, %s682_s20  }
  0x12   :  { %s683_s23 = smov [#allocation4]   ;;  %s654_s27 = scalar_lea.hbm %s864_s5, 1024 }
  0x13   :  { %s41_s24 = sshll.u32 %s683_s23, 4  ;;  %p655_p8 = scmp.ne.s32.totalorder %s864_s5, %s654_s27  ;;  %s42_s24 = int_to_ptr.vmem [resolvable:$true] %s41_s24 }
  0x14   :  { %p658_p9 = scmp.lt.u32.totalorder %s654_s27, %s864_s5 }
  0x16   :  { %p660_p10 = pnand %p658_p9, %p655_p8 }
  0x18   :  { %663 = shalt.err (!%p660_p10)
}
  0x19   :  { %s664_s12 = scalar_lea.vmem %s42_s24, 1024  ;;  %p669_p12 = scmp.lt.s32.totalorder %s42_s24, %s42_s24 }
  0x1a   :  { %p665_p11 = scmp.ne.s32.totalorder %s42_s24, %s664_s12  ;;  %p670_p13 = scmp.lt.s32.totalorder %s664_s12, %s664_s12 }
  0x1c   :  { %p671_p0 = por %p670_p13, %p669_p12 }
  0x1e   :  { %p672_p1 = pnand %p671_p0, %p665_p11 }
  0x20   :  { %675 = shalt.err (!%p672_p1)
}
  0x21   :  { %47 = dma.hbm_to_vmem [thread:$0]  %s864_s5, 1024, %s42_s24, [#allocation5], %s681_s19, %s681_s19, %s682_s20  }
  0x22   :  { %676 = dma.done.wait [#allocation3], 128  }
  0x23   :  { %677 = vsyncadd [#allocation3], 4294967168 }
  0x24   :  { %678 = dma.done.wait [#allocation5], 1024  }
  0x25   :  { %679 = vsyncadd [#allocation5], 4294966272  ;;  %v684_v0 = vmov 0.0   ;;  %vm685_vm0 = vmmov 0   ;;  %v605_v1 = vld [vmem:[#allocation2] sm:$0xff]   ;;  %vm78_vm1 = vcmask 130048  }
  0x26   :  { %533 = vmatprep.subr.bf16.mxu0 %v684_v0  ;;  %535 = vmatprep.mubr.msk.bf16.mxu0 %vm685_vm0, %v684_v0  ;;  %v61_v2 = vld [vmem:[%s859_s0] sm:$0xff]  ;;  %v607_v5 = vld [vmem:[%s862_s3 + $0x8] sm:$0xff]   ;;  %v608_v6 = vld [vmem:[%s862_s3 + $0x10] sm:$0xff]   ;;  %vm466_vm2 = vcmask 31744  }
  0x27   :  { %539 = vmatprep.subr.bf16.mxu1 %v684_v0  ;;  %555 = vmatprep.mubr.msk.bf16.mxu1 %vm685_vm0, %v684_v0  ;;  %v62_v3 = vpack.c.bf16 %v61_v2, %v61_v2  ;;  %v606_v4 = vld [vmem:[%s862_s3] sm:$0xff]   ;;  %v609_v7 = vld [vmem:[%s862_s3 + $0x18] sm:$0xff]   ;;  %v611_v9 = vld [vmem:[%s862_s3 + $0x28] sm:$0xff]  }
  0x28   :  { %534 = vmatpush3.bf16.msra.mxu0 %v605_v1  ;;  %540 = vmatpush3.bf16.msra.mxu1 %v606_v4  ;;  %v610_v8 = vld [vmem:[%s862_s3 + $0x20] sm:$0xff]   ;;  %v612_v10 = vld [vmem:[%s862_s3 + $0x30] sm:$0xff]   ;;  %v613_v11 = vld [vmem:[%s862_s3 + $0x38] sm:$0xff]  }
  0x29   :  { %559 = vmatprep.subr.bf16.mxu0 %v684_v0  ;;  %541 = vmatprep.subr.bf16.mxu1 %v684_v0  ;;  %v614_v12 = vld [vmem:[#allocation4] sm:$0xff]   ;;  %v615_v13 = vld [vmem:[#allocation4 + $0x8] sm:$0xff]   ;;  %v616_v14 = vld [vmem:[#allocation4 + $0x10] sm:$0xff]  }
  0x2a   :  { %v617_v15 = vld [vmem:[#allocation4 + $0x18] sm:$0xff]   ;;  %v618_v16 = vld [vmem:[#allocation4 + $0x20] sm:$0xff]   ;;  %v619_v17 = vld [vmem:[#allocation4 + $0x28] sm:$0xff]  }
  0x2b   :  { %536 = vmatmul.mubr.msk.bf16.vlgmr.msra.gmra.mrb[0].mxu0 %vm78_vm1, %v62_v3  ;;  %v474_v18 = vld [vmem:[%s861_s2] ss:$0 sm:$0xff]  ;;  %v620_v26 = vld [vmem:[#allocation4 + $0x30] sm:$0xff]   ;;  %v623_v29 = vld [vmem:[%s866_s7 + $0x8] sm:$0xff]  }
  0x2c   :  { %575 = vmatprep.mubr.msk.bf16.mxu0 %vm685_vm0, %v684_v0  ;;  %542 = vmatpush3.bf16.msra.mxu1 %v607_v5  ;;  %v621_v27 = vld [vmem:[#allocation4 + $0x38] sm:$0xff]   ;;  %v624_v30 = vld [vmem:[%s866_s7 + $0x10] sm:$0xff]   ;;  %v625_v31 = vld [vmem:[%s866_s7 + $0x18] sm:$0xff]  }
  0x2d   :  { %543 = vmatprep.subr.bf16.mxu1 %v684_v0  ;;  %560 = vmatpush3.bf16.msra.mxu0 %v614_v12  ;;  %v622_v28 = vld [vmem:[%s866_s7] sm:$0xff]   ;;  %v627_v41 = vld [vmem:[%s866_s7 + $0x28] sm:$0xff]   ;;  %v628_v42 = vld [vmem:[%s866_s7 + $0x30] sm:$0xff]  }
  0x2e   :  { %561 = vmatprep.subr.bf16.mxu0 %v684_v0  ;;  %v477_v32 = vld [vmem:[%s863_s4] ss:$0 sm:$0xff]  ;;  %v629_v43 = vld [vmem:[%s866_s7 + $0x38] sm:$0xff]  }
  0x2f   :  { %v626_v40 = vld [vmem:[%s866_s7 + $0x20] sm:$0xff]  }
  0x30   :  { %544 = vmatpush3.bf16.msra.mxu1 %v608_v6  ;;  %v486_v44 = vld [vmem:[%s865_s6] ss:$0 sm:$0xff] }
  0x31   :  { %545 = vmatprep.subr.bf16.mxu1 %v684_v0  ;;  %562 = vmatpush3.bf16.msra.mxu0 %v615_v13  ;;  %v495_v56 = vld [vmem:[%s867_s8] ss:$0 sm:$0xff] }
  0x32   :  { %563 = vmatprep.subr.bf16.mxu0 %v684_v0 }
  0x34   :  { %546 = vmatpush3.bf16.msra.mxu1 %v609_v7 }
  0x35   :  { %547 = vmatprep.subr.bf16.mxu1 %v684_v0  ;;  %564 = vmatpush3.bf16.msra.mxu0 %v616_v14 }
  0x36   :  { %565 = vmatprep.subr.bf16.mxu0 %v684_v0 }
  0x38   :  { %548 = vmatpush3.bf16.msra.mxu1 %v610_v8 }
  0x39   :  { %549 = vmatprep.subr.bf16.mxu1 %v684_v0  ;;  %566 = vmatpush3.bf16.msra.mxu0 %v617_v15 }
  0x3a   :  { %567 = vmatprep.subr.bf16.mxu0 %v684_v0 }
  0x3c   :  { %550 = vmatpush3.bf16.msra.mxu1 %v611_v9 }
  0x3d   :  { %551 = vmatprep.subr.bf16.mxu1 %v684_v0  ;;  %568 = vmatpush3.bf16.msra.mxu0 %v618_v16 }
  0x3e   :  { %569 = vmatprep.subr.bf16.mxu0 %v684_v0 }
  0x40   :  { %552 = vmatpush3.bf16.msra.mxu1 %v612_v10 }
  0x41   :  { %553 = vmatprep.subr.bf16.mxu1 %v684_v0  ;;  %570 = vmatpush3.bf16.msra.mxu0 %v619_v17 }
  0x42   :  { %571 = vmatprep.subr.bf16.mxu0 %v684_v0 }
  0x44   :  { %554 = vmatpush3.bf16.msra.mxu1 %v613_v11 }
  0x45   :  { %579 = vmatprep.subr.bf16.mxu1 %v684_v0  ;;  %572 = vmatpush3.bf16.msra.mxu0 %v620_v26 }
  0x46   :  { %573 = vmatprep.subr.bf16.mxu0 %v684_v0 }
  0x49   :  { %574 = vmatpush3.bf16.msra.mxu0 %v621_v27 }
  0xfe   :  { %v116_v19 = vpop.f32.mrb[0].mxu0 }
  0xff   :  { %v117_v20 = vadd.f32 %v474_v18, %v116_v19  ;;  %v537_v21 = vpop.f32.mrb[1].mxu0 }
 0x100   :  { %v119_v22 = vpop.f32.mrb[2].mxu0 }
 0x101   :  { %v122_v23 = vmax.f32 %v117_v20, 0.0  ;;  %v538_v24 = vpop.f32.mrb[3].mxu0 }
 0x103   :  { %v123_v25 = vpack.c.bf16 %v122_v23, %v122_v23 }
 0x105   :  { %556 = vmatmul.mubr.bf16.vlgmr.msra.gmra.mrb[0].mxu1 %v123_v25 }
 0x106   :  { %595 = vmatprep.mubr.msk.bf16.mxu1 %vm685_vm0, %v684_v0  ;;  %580 = vmatpush3.bf16.msra.mxu1 %v622_v28 }
 0x107   :  { %581 = vmatprep.subr.bf16.mxu1 %v684_v0 }
 0x10a   :  { %582 = vmatpush3.bf16.msra.mxu1 %v623_v29 }
 0x10b   :  { %583 = vmatprep.subr.bf16.mxu1 %v684_v0 }
 0x10e   :  { %584 = vmatpush3.bf16.msra.mxu1 %v624_v30 }
 0x10f   :  { %585 = vmatprep.subr.bf16.mxu1 %v684_v0 }
 0x112   :  { %586 = vmatpush3.bf16.msra.mxu1 %v625_v31 }
 0x113   :  { %587 = vmatprep.subr.bf16.mxu1 %v684_v0 }
 0x116   :  { %588 = vmatpush3.bf16.msra.mxu1 %v626_v40 }
 0x117   :  { %589 = vmatprep.subr.bf16.mxu1 %v684_v0 }
 0x11a   :  { %590 = vmatpush3.bf16.msra.mxu1 %v627_v41 }
 0x11b   :  { %591 = vmatprep.subr.bf16.mxu1 %v684_v0 }
 0x11e   :  { %592 = vmatpush3.bf16.msra.mxu1 %v628_v42 }
 0x11f   :  { %593 = vmatprep.subr.bf16.mxu1 %v684_v0 }
 0x122   :  { %594 = vmatpush3.bf16.msra.mxu1 %v629_v43 }
 0x1d8   :  { %v229_v33 = vpop.f32.mrb[0].mxu1 }
 0x1d9   :  { %v230_v34 = vadd.f32 %v477_v32, %v229_v33  ;;  %v557_v35 = vpop.f32.mrb[1].mxu1 }
 0x1da   :  { %v232_v36 = vpop.f32.mrb[2].mxu1 }
 0x1db   :  { %v235_v37 = vmax.f32 %v230_v34, 0.0  ;;  %v558_v38 = vpop.f32.mrb[3].mxu1 }
 0x1dd   :  { %v236_v39 = vpack.c.bf16 %v235_v37, %v235_v37 }
 0x1df   :  { %576 = vmatmul.mubr.bf16.vlgmr.msra.gmra.mrb[4].mxu0 %v236_v39 }
 0x2b2   :  { %v342_v45 = vpop.f32.mrb[4].mxu0 }
 0x2b3   :  { %v343_v46 = vadd.f32 %v486_v44, %v342_v45  ;;  %v577_v47 = vpop.f32.mrb[5].mxu0 }
 0x2b4   :  { %v345_v48 = vpop.f32.mrb[6].mxu0 }
 0x2b5   :  { %v348_v49 = vadd.f32 3.0, %v343_v46  ;;  %v578_v50 = vpop.f32.mrb[7].mxu0 }
 0x2b7   :  { %v349_v51 = vmax.f32 %v348_v49, 0.0 }
 0x2b9   :  { %v350_v52 = vmin.f32 %v349_v51, 6.0 }
 0x2bb   :  { %v351_v53 = vmul.f32 %v350_v52, %v343_v46 }
 0x2bd   :  { %v352_v54 = vmul.f32 0.16666667, %v351_v53 }
 0x2bf   :  { %v353_v55 = vpack.c.bf16 %v352_v54, %v352_v54 }
 0x2c1   :  { %596 = vmatmul.mubr.bf16.vlgmr.msra.gmra.mrb[4].mxu1 %v353_v55 }
 0x394   :  { %v459_v57 = vpop.f32.mrb[4].mxu1 }
 0x395   :  { %v460_v58 = vadd.f32 %v495_v56, %v459_v57  ;;  %v597_v59 = vpop.f32.mrb[5].mxu1 }
 0x396   :  { %v462_v60 = vpop.f32.mrb[6].mxu1 }
 0x397   :  { %630 = vtanh.f32 %v460_v58  ;;  %v598_v61 = vpop.f32.mrb[7].mxu1 }
 0x3a1   :  { %v631_v62 = vpop.eup %630 }
 0x3a2   :  { %467 = vst.msk [vmem:[%s868_s9] sm:$0xff] %vm466_vm2, %v631_v62 }
 0x3a3   :  { %472 = vsyncpa [#allocation3], 1 }
 0x3a4   :  { %473 = vsyncpa [#allocation5], 1 }

</bundles_post_ra>
